<compile_context>
chip_gen: v7x
topology: tpu7x:2x2x1
jax: 0.10.0
libtpu: 0.0.40
codegen_flags: <defaults>
</compile_context>

<pallas_src>
import functools
import math

import jax
import jax.numpy as jnp
from jax import lax
from jax.experimental import pallas as pl
from jax.experimental.pallas import tpu as pltpu


# --------------------------------------------------------------------------
# Generation-aware VMEM limit (~3/4 physical; falls back to a safe 48 MiB)
# --------------------------------------------------------------------------
def _vmem_limit_bytes():
    try:
        cap = getattr(pltpu.get_tpu_info(), "vmem_capacity_bytes", None)
        if cap:
            return int(cap) * 3 // 4          # 96 MiB on 128-MiB parts, 48 MiB on v7x
    except Exception:
        pass
    return 48 * 1024 * 1024


_VMEM_LIMIT = _vmem_limit_bytes()


# --------------------------------------------------------------------------
# Small shape helpers
# --------------------------------------------------------------------------
def _round_up(n, m):
    return ((n + m - 1) // m) * m


def _pad_len(s):
    """Pad sequence length to a lane/sublane friendly multiple."""
    return _round_up(s, 128 if s >= 128 else 8)


def _pad_seq(x, s_pad):
    b, s, d = x.shape
    if s_pad == s:
        return x
    return jnp.pad(x, ((0, 0), (0, s_pad - s), (0, 0)))


def _pick_tile(n, prefs=(256, 128)):
    """Largest preferred tile dividing n; else the full extent (toy shapes)."""
    for p in prefs:
        if n >= p and n % p == 0:
            return p
    return n


def _pick_n_tile(n, k, n_weights, budget_bytes=16 << 20):
    """Keep full (K, N) weights resident if small; otherwise lane-dense N tiles."""
    if n_weights * k * n * 2 <= budget_bytes:
        return n
    for p in (1024, 512, 256, 128):
        if n % p == 0:
            return p
    return n


def _head_group(h, d_k):
    """Smallest divisor hg of h with hg*d_k lane-dense (mult of 128); else all heads."""
    for hg in range(1, h + 1):
        if h % hg == 0 and (hg * d_k) % 128 == 0:
            return hg
    return h


def _kv_block_spec(shape, index_map, deep):
    """KV BlockSpec, optionally 3-deep pipelined when the KV grid axis is long."""
    if deep and hasattr(pl, "Buffered"):
        try:
            return pl.BlockSpec(shape, index_map, pipeline_mode=pl.Buffered(3))
        except Exception:
            pass
    return pl.BlockSpec(shape, index_map)


# --------------------------------------------------------------------------
# Linear projection kernel:  y = cast(x) @ W_t + b   (W_t already (in, out))
# The f32 -> compute-dtype cast is fused into the kernel.
# --------------------------------------------------------------------------
def _linear_kernel(x_ref, w_ref, b_ref, o_ref):
    x = x_ref[...].astype(w_ref.dtype)
    acc = jnp.dot(x, w_ref[...], preferred_element_type=jnp.float32)
    o_ref[...] = (acc + b_ref[...]).astype(o_ref.dtype)


def _linear(x2d, w_t, b, out_dtype):
    """x2d: (M, K) any float dtype, w_t: (K, N) compute dtype, b: (1, N) f32."""
    M, K = x2d.shape
    N = w_t.shape[1]
    tm = _pick_tile(M, (256, 128))
    tn = _pick_n_tile(N, K, 1)
    return pl.pallas_call(
        _linear_kernel,
        out_shape=jax.ShapeDtypeStruct((M, N), out_dtype),
        grid_spec=pltpu.PrefetchScalarGridSpec(
            num_scalar_prefetch=0,
            grid=(M // tm, N // tn),
            in_specs=[
                pl.BlockSpec((tm, K), lambda i, j: (i, 0)),
                pl.BlockSpec((K, tn), lambda i, j: (0, j)),
                pl.BlockSpec((1, tn), lambda i, j: (0, j)),
            ],
            out_specs=pl.BlockSpec((tm, tn), lambda i, j: (i, j)),
        ),
        compiler_params=pltpu.CompilerParams(
            dimension_semantics=("parallel", "parallel"),
            vmem_limit_bytes=_VMEM_LIMIT),
    )(x2d, w_t, b)


# --------------------------------------------------------------------------
# Fused Q/K/V projection: activation is read (and cast) once per row tile,
# three MXU matmuls, three bf16 outputs.
# --------------------------------------------------------------------------
def _qkv_kernel(x_ref, wq_ref, wk_ref, wv_ref, bq_ref, bk_ref, bv_ref,
                q_ref, k_ref, v_ref):
    x = x_ref[...].astype(wq_ref.dtype)
    q_ref[...] = (jnp.dot(x, wq_ref[...], preferred_element_type=jnp.float32)
                  + bq_ref[...]).astype(q_ref.dtype)
    k_ref[...] = (jnp.dot(x, wk_ref[...], preferred_element_type=jnp.float32)
                  + bk_ref[...]).astype(k_ref.dtype)
    v_ref[...] = (jnp.dot(x, wv_ref[...], preferred_element_type=jnp.float32)
                  + bv_ref[...]).astype(v_ref.dtype)


def _qkv_projection(x2d, wq_t, wk_t, wv_t, bq, bk, bv, out_dtype):
    M, K = x2d.shape
    N = wq_t.shape[1]
    tm = _pick_tile(M, (256, 128))
    tn = _pick_n_tile(N, K, 3)
    w_spec = pl.BlockSpec((K, tn), lambda i, j: (0, j))
    b_spec = pl.BlockSpec((1, tn), lambda i, j: (0, j))
    o_spec = pl.BlockSpec((tm, tn), lambda i, j: (i, j))
    out_sd = jax.ShapeDtypeStruct((M, N), out_dtype)
    return pl.pallas_call(
        _qkv_kernel,
        out_shape=(out_sd, out_sd, out_sd),
        grid_spec=pltpu.PrefetchScalarGridSpec(
            num_scalar_prefetch=0,
            grid=(M // tm, N // tn),
            in_specs=[pl.BlockSpec((tm, K), lambda i, j: (i, 0)),
                      w_spec, w_spec, w_spec, b_spec, b_spec, b_spec],
            out_specs=(o_spec, o_spec, o_spec),
        ),
        compiler_params=pltpu.CompilerParams(
            dimension_semantics=("parallel", "parallel"),
            vmem_limit_bytes=_VMEM_LIMIT),
    )(x2d, wq_t, wk_t, wv_t, bq, bk, bv)


# --------------------------------------------------------------------------
# Flash-style attention over flat (B*S, D) activations.
# Grid: (B*head_groups, q_tile, kv_block); kv_block is the innermost
# "arbitrary" reduction axis; per-head m/l/acc live in VMEM scratch.
# Each grid step handles `hg` heads (lane-dense output block) and `n_inner`
# KV sub-tiles (amortizes per-grid-step overhead).
# --------------------------------------------------------------------------
def _flash_kernel(q_ref, k_ref, v_ref, o_ref, m_ref, l_ref, acc_ref, *,
                  hg, d_k, n_inner, tk_inner, kv_blk, sk, need_mask):
    ki = pl.program_id(2)

    @pl.when(ki == 0)
    def _init():
        m_ref[...] = jnp.full(m_ref.shape, -jnp.inf, jnp.float32)
        l_ref[...] = jnp.zeros(l_ref.shape, jnp.float32)
        acc_ref[...] = jnp.zeros(acc_ref.shape, jnp.float32)

    q_all = q_ref[...]                      # (tq, hg*d_k) bf16, pre-scaled 1/sqrt(d_k)

    for g in range(n_inner):                # static unrolled loop over KV sub-tiles
        k_sub = k_ref[g * tk_inner:(g + 1) * tk_inner, :]   # (tk, hg*d_k)
        v_sub = v_ref[g * tk_inner:(g + 1) * tk_inner, :]
        if need_mask:
            kv_pos = (ki * kv_blk + g * tk_inner
                      + lax.broadcasted_iota(jnp.int32, (1, tk_inner), 1))
            kv_valid = kv_pos < sk                           # (1, tk) ragged-tail mask

        for h in range(hg):                 # static unrolled loop over heads in group
            q = q_all[:, h * d_k:(h + 1) * d_k]
            k = k_sub[:, h * d_k:(h + 1) * d_k]
            v = v_sub[:, h * d_k:(h + 1) * d_k]

            # scores: (tq, tk), f32 accumulation on the MXU
            s = lax.dot_general(q, k, (((1,), (1,)), ((), ())),
                                preferred_element_type=jnp.float32)
            if need_mask:
                s = jnp.where(kv_valid, s, -jnp.inf)

            m_prev = m_ref[h]
            m_new = jnp.maximum(m_prev, jnp.max(s, axis=-1, keepdims=True))
            alpha = jnp.exp(m_prev - m_new)
            p = jnp.exp(s - m_new)

            l_ref[h] = alpha * l_ref[h] + jnp.sum(p, axis=-1, keepdims=True)
            acc_ref[h] = alpha * acc_ref[h] + jnp.dot(
                p.astype(v.dtype), v, preferred_element_type=jnp.float32)
            m_ref[h] = m_new

    @pl.when(ki == pl.num_programs(2) - 1)
    def _finalize():
        parts = []
        for h in range(hg):
            inv_l = pl.reciprocal(l_ref[h], approx=True)     # EUP vrcp — free slot
            parts.append((acc_ref[h] * inv_l).astype(o_ref.dtype))
        o_ref[...] = parts[0] if hg == 1 else jnp.concatenate(parts, axis=-1)


def _flash_attention(q2d, k2d, v2d, *, B, H, d_k, Sq_pad, Sk_pad, Sk,
                     compute_dtype):
    """q2d: (B*Sq_pad, D), k2d/v2d: (B*Sk_pad, D) — all compute dtype, q pre-scaled."""
    D = H * d_k
    hg = _head_group(H, d_k)                # heads per grid step (lane-dense block)
    n_hg = H // hg
    tq = _pick_tile(Sq_pad, (128, 256))     # prefer tq=128 (vreg pressure)
    tk = _pick_tile(Sk_pad, (256, 128))

    # Group G KV sub-tiles into a single block (amortize ~0.35us per-step overhead),
    # bounded so K+V blocks stay cheap in VMEM even 3-deep buffered.
    G = 1
    while (G < 4 and Sk_pad % (2 * G * tk) == 0
           and (2 * G * tk) * hg * d_k * 2 * 2 * 3 <= (8 << 20)):
        G *= 2
    kv_blk = G * tk

    n_q = Sq_pad // tq
    n_kv = Sk_pad // kv_blk
    grid = (B * n_hg, n_q, n_kv)            # flattened (batch, head-group) leading axis

    kernel = functools.partial(
        _flash_kernel, hg=hg, d_k=d_k, n_inner=G, tk_inner=tk,
        kv_blk=kv_blk, sk=Sk, need_mask=(Sk_pad != Sk))

    q_map = lambda bh, qi, ki: (bh // n_hg * n_q + qi, bh % n_hg)
    kv_map = lambda bh, qi, ki: (bh // n_hg * n_kv + ki, bh % n_hg)

    return pl.pallas_call(
        kernel,
        out_shape=jax.ShapeDtypeStruct((B * Sq_pad, D), compute_dtype),
        grid_spec=pltpu.PrefetchScalarGridSpec(
            num_scalar_prefetch=0,
            grid=grid,
            in_specs=[
                pl.BlockSpec((tq, hg * d_k), q_map),
                _kv_block_spec((kv_blk, hg * d_k), kv_map, deep=(n_kv >= 3)),
                _kv_block_spec((kv_blk, hg * d_k), kv_map, deep=(n_kv >= 3)),
            ],
            out_specs=pl.BlockSpec((tq, hg * d_k), q_map),
            scratch_shapes=[
                pltpu.VMEM((hg, tq, 1), jnp.float32),      # running max   m (per head)
                pltpu.VMEM((hg, tq, 1), jnp.float32),      # running denom l (per head)
                pltpu.VMEM((hg, tq, d_k), jnp.float32),    # running numerator
            ],
        ),
        compiler_params=pltpu.CompilerParams(
            dimension_semantics=("parallel", "parallel", "arbitrary"),
            vmem_limit_bytes=_VMEM_LIMIT),
    )(q2d, k2d, v2d)


# --------------------------------------------------------------------------
# Full MultiHeadedAttention forward (mask=None, eval mode — as in the module)
# --------------------------------------------------------------------------
def multi_headed_attention(query, key, value, params, h, *,
                           compute_dtype=jnp.bfloat16):
    B, Sq, D = query.shape
    _, Sk, _ = key.shape
    assert value.shape == key.shape and D % h == 0
    d_k = D // h
    scale = 1.0 / math.sqrt(d_k)
    cd = compute_dtype
    out_dtype = query.dtype

    # One-time parameter prep (wrapper-side, not hot-path): PyTorch Linear keeps
    # W as (out, in) — pre-transpose to (in, out); fold 1/sqrt(d_k) into Q params.
    wq_t = (params['wq'].T * scale).astype(cd)
    wk_t = params['wk'].T.astype(cd)
    wv_t = params['wv'].T.astype(cd)
    wo_t = params['wo'].T.astype(cd)
    bq = (params['bq'] * scale).reshape(1, D).astype(jnp.float32)
    bk = params['bk'].reshape(1, D).astype(jnp.float32)
    bv = params['bv'].reshape(1, D).astype(jnp.float32)
    bo = params['bo'].reshape(1, D).astype(jnp.float32)

    # Pad ragged sequence lengths (lane/sublane alignment); padded KV positions
    # are masked inside the flash kernel, padded Q rows are sliced off at the end.
    Sq_pad, Sk_pad = _pad_len(Sq), _pad_len(Sk)
    qx = _pad_seq(query, Sq_pad)
    same_input = (query is key) and (key is value)

    if same_input:
        # Fused QKV projection: activation read (and cast) once from HBM.
        x2d = qx.reshape(B * Sq_pad, D)
        q2d, k2d, v2d = _qkv_projection(x2d, wq_t, wk_t, wv_t, bq, bk, bv, cd)
        Sk_pad = Sq_pad
    else:
        kx = _pad_seq(key, Sk_pad)
        vx = _pad_seq(value, Sk_pad)
        q2d = _linear(qx.reshape(B * Sq_pad, D), wq_t, bq, cd)
        k2d = _linear(kx.reshape(B * Sk_pad, D), wk_t, bk, cd)
        v2d = _linear(vx.reshape(B * Sk_pad, D), wv_t, bv, cd)

    # Flash attention reads/writes the flat (B*S, D) buffers directly — no head
    # split/merge transposes in the wrapper.
    ctx2d = _flash_attention(q2d, k2d, v2d, B=B, H=h, d_k=d_k,
                             Sq_pad=Sq_pad, Sk_pad=Sk_pad, Sk=Sk,
                             compute_dtype=cd)                    # (B*Sq_pad, D)

    out2d = _linear(ctx2d, wo_t, bo, out_dtype)
    out = out2d.reshape(B, Sq_pad, D)
    return out[:, :Sq] if Sq_pad != Sq else out


# --------------------------------------------------------------------------
# References
# --------------------------------------------------------------------------
def _reference_f32(query, key, value, params, h):
    """Pure-JAX f32 reference mirroring the PyTorch forward exactly."""
    B, Sq, D = query.shape
    d_k = D // h
    lin = lambda t, w, b: t @ w.T + b
    q = lin(query, params['wq'], params['bq']).reshape(B, -1, h, d_k).transpose(0, 2, 1, 3)
    k = lin(key, params['wk'], params['bk']).reshape(B, -1, h, d_k).transpose(0, 2, 1, 3)
    v = lin(value, params['wv'], params['bv']).reshape(B, -1, h, d_k).transpose(0, 2, 1, 3)
    s = jnp.einsum('bhqd,bhkd->bhqk', q, k) / math.sqrt(d_k)
    p = jax.nn.softmax(s, axis=-1)
    ctx = jnp.einsum('bhqk,bhkd->bhqd', p, v).transpose(0, 2, 1, 3).reshape(B, Sq, D)
    return lin(ctx, params['wo'], params['bo'])


def _reference_bf16_mirror(query, key, value, params, h):
    """Mirrors the kernel's bf16-compute / f32-accumulate path (tight check)."""
    B, Sq, D = query.shape
    d_k = D // h
    cd = jnp.bfloat16
    scale = 1.0 / math.sqrt(d_k)

    def lin(t, w_t, b):
        return (jnp.dot(t.reshape(-1, D).astype(cd), w_t.astype(cd),
                        preferred_element_type=jnp.float32) + b)

    q = lin(query, params['wq'].T * scale, params['bq'] * scale).astype(cd)
    k = lin(key, params['wk'].T, params['bk']).astype(cd)
    v = lin(value, params['wv'].T, params['bv']).astype(cd)
    q = q.reshape(B, -1, h, d_k).transpose(0, 2, 1, 3)
    k = k.reshape(B, -1, h, d_k).transpose(0, 2, 1, 3)
    v = v.reshape(B, -1, h, d_k).transpose(0, 2, 1, 3)

    s = jnp.einsum('bhqd,bhkd->bhqk', q, k, preferred_element_type=jnp.float32)
    m = jnp.max(s, axis=-1, keepdims=True)
    e = jnp.exp(s - m)
    l = jnp.sum(e, axis=-1, keepdims=True)
    ctx = jnp.einsum('bhqk,bhkd->bhqd', e.astype(cd), v,
                     preferred_element_type=jnp.float32) / l
    ctx = ctx.transpose(0, 2, 1, 3).reshape(B, Sq, D).astype(cd)
    out = jnp.dot(ctx.reshape(-1, D), params['wo'].T.astype(cd),
                  preferred_element_type=jnp.float32) + params['bo']
    return out.reshape(B, Sq, D)


if __name__ == "__main__":
    B, S, D, H = 2, 8, 32, 4

    key = jax.random.PRNGKey(0)
    keys = jax.random.split(key, 9)
    init_scale = 1.0 / math.sqrt(D)
    params = {
        'wq': jax.random.uniform(keys[0], (D, D), jnp.float32, -init_scale, init_scale),
        'bq': jax.random.uniform(keys[1], (D,),   jnp.float32, -init_scale, init_scale),
        'wk': jax.random.uniform(keys[2], (D, D), jnp.float32, -init_scale, init_scale),
        'bk': jax.random.uniform(keys[3], (D,),   jnp.float32, -init_scale, init_scale),
        'wv': jax.random.uniform(keys[4], (D, D), jnp.float32, -init_scale, init_scale),
        'bv': jax.random.uniform(keys[5], (D,),   jnp.float32, -init_scale, init_scale),
        'wo': jax.random.uniform(keys[6], (D, D), jnp.float32, -init_scale, init_scale),
        'bo': jax.random.uniform(keys[7], (D,),   jnp.float32, -init_scale, init_scale),
    }
    x = jax.random.normal(keys[8], (B, S, D), jnp.float32)

    out = multi_headed_attention(x, x, x, params, H)   # self-attention
    out = jax.block_until_ready(out)
    assert out.shape == (B, S, D) and out.dtype == x.dtype

    ref_mirror = _reference_bf16_mirror(x, x, x, params, H)
    ref_f32 = _reference_f32(x, x, x, params, H)

    err_mirror = float(jnp.max(jnp.abs(out - ref_mirror)))
    err_f32 = float(jnp.max(jnp.abs(out - ref_f32)))
    assert err_mirror < 1e-2, f"bf16-mirror max abs err = {err_mirror}"
    assert err_f32 < 7e-2, f"f32 reference max abs err = {err_f32}"

    print("KERNEL_OK")
</pallas_src>

<mosaic_0001>
module attributes {stable_mosaic.version = 11 : i64} {
  func.func @_qkv_kernel(%arg0: i32, %arg1: i32, %arg2: memref<16x32xf32, #tpu.memory_space<vmem>>, %arg3: memref<32x32xbf16, #tpu.memory_space<vmem>>, %arg4: memref<32x32xbf16, #tpu.memory_space<vmem>>, %arg5: memref<32x32xbf16, #tpu.memory_space<vmem>>, %arg6: memref<1x32xf32, #tpu.memory_space<vmem>>, %arg7: memref<1x32xf32, #tpu.memory_space<vmem>>, %arg8: memref<1x32xf32, #tpu.memory_space<vmem>>, %arg9: memref<16x32xbf16, #tpu.memory_space<vmem>>, %arg10: memref<16x32xbf16, #tpu.memory_space<vmem>>, %arg11: memref<16x32xbf16, #tpu.memory_space<vmem>>) attributes {dimension_semantics = [#tpu.dimension_semantics<parallel>, #tpu.dimension_semantics<parallel>], iteration_bounds = array<i64: 1, 1>, scalar_prefetch = 0 : i64, scratch_operands = 0 : i64, tpu.core_type = #tpu.core_type<tc>, window_params = [{transform_indices = @transform_0, window_bounds = array<i64: 16, 32>}, {transform_indices = @transform_1, window_bounds = array<i64: 32, 32>}, {transform_indices = @transform_2, window_bounds = array<i64: 32, 32>}, {transform_indices = @transform_3, window_bounds = array<i64: 32, 32>}, {transform_indices = @transform_4, window_bounds = array<i64: 1, 32>}, {transform_indices = @transform_5, window_bounds = array<i64: 1, 32>}, {transform_indices = @transform_6, window_bounds = array<i64: 1, 32>}, {transform_indices = @transform_7, window_bounds = array<i64: 16, 32>}, {transform_indices = @transform_8, window_bounds = array<i64: 16, 32>}, {transform_indices = @transform_9, window_bounds = array<i64: 16, 32>}]} {
    %c0 = arith.constant 0 : index
    %c0_0 = arith.constant 0 : index
    %0 = vector.load %arg2[%c0, %c0_0] : memref<16x32xf32, #tpu.memory_space<vmem>>, vector<16x32xf32>
    %1 = arith.truncf %0 : vector<16x32xf32> to vector<16x32xbf16>
    %c0_1 = arith.constant 0 : index
    %c0_2 = arith.constant 0 : index
    %2 = vector.load %arg3[%c0_1, %c0_2] : memref<32x32xbf16, #tpu.memory_space<vmem>>, vector<32x32xbf16>
    %cst = arith.constant dense<0.000000e+00> : vector<16x32xf32>
    %3 = tpu.matmul %1, %2, %cst {dimension_numbers = #tpu.dot_dimension_numbers<[1], [0], [0], [1], [0, 0, 1, 1], [], []>} : vector<16x32xbf16>, vector<32x32xbf16>, vector<16x32xf32> -> vector<16x32xf32>
    %c0_3 = arith.constant 0 : index
    %c0_4 = arith.constant 0 : index
    %4 = vector.load %arg6[%c0_3, %c0_4] : memref<1x32xf32, #tpu.memory_space<vmem>>, vector<1x32xf32>
    %5 = vector.broadcast %4 : vector<1x32xf32> to vector<16x32xf32>
    %6 = arith.addf %3, %5 : vector<16x32xf32>
    %7 = arith.truncf %6 : vector<16x32xf32> to vector<16x32xbf16>
    %c0_5 = arith.constant 0 : index
    %c0_6 = arith.constant 0 : index
    %8 = vector.load %arg9[%c0_5, %c0_6] : memref<16x32xbf16, #tpu.memory_space<vmem>>, vector<16x32xbf16>
    tpu.vector_store %arg9[%c0_5, %c0_6], %7 {strides = array<i32>} : memref<16x32xbf16, #tpu.memory_space<vmem>>, vector<16x32xbf16>,
    %c0_7 = arith.constant 0 : index
    %c0_8 = arith.constant 0 : index
    %9 = vector.load %arg4[%c0_7, %c0_8] : memref<32x32xbf16, #tpu.memory_space<vmem>>, vector<32x32xbf16>
    %cst_9 = arith.constant dense<0.000000e+00> : vector<16x32xf32>
    %10 = tpu.matmul %1, %9, %cst_9 {dimension_numbers = #tpu.dot_dimension_numbers<[1], [0], [0], [1], [0, 0, 1, 1], [], []>} : vector<16x32xbf16>, vector<32x32xbf16>, vector<16x32xf32> -> vector<16x32xf32>
    %c0_10 = arith.constant 0 : index
    %c0_11 = arith.constant 0 : index
    %11 = vector.load %arg7[%c0_10, %c0_11] : memref<1x32xf32, #tpu.memory_space<vmem>>, vector<1x32xf32>
    %12 = vector.broadcast %11 : vector<1x32xf32> to vector<16x32xf32>
    %13 = arith.addf %10, %12 : vector<16x32xf32>
    %14 = arith.truncf %13 : vector<16x32xf32> to vector<16x32xbf16>
    %c0_12 = arith.constant 0 : index
    %c0_13 = arith.constant 0 : index
    %15 = vector.load %arg10[%c0_12, %c0_13] : memref<16x32xbf16, #tpu.memory_space<vmem>>, vector<16x32xbf16>
    tpu.vector_store %arg10[%c0_12, %c0_13], %14 {strides = array<i32>} : memref<16x32xbf16, #tpu.memory_space<vmem>>, vector<16x32xbf16>,
    %c0_14 = arith.constant 0 : index
    %c0_15 = arith.constant 0 : index
    %16 = vector.load %arg5[%c0_14, %c0_15] : memref<32x32xbf16, #tpu.memory_space<vmem>>, vector<32x32xbf16>
    %cst_16 = arith.constant dense<0.000000e+00> : vector<16x32xf32>
    %17 = tpu.matmul %1, %16, %cst_16 {dimension_numbers = #tpu.dot_dimension_numbers<[1], [0], [0], [1], [0, 0, 1, 1], [], []>} : vector<16x32xbf16>, vector<32x32xbf16>, vector<16x32xf32> -> vector<16x32xf32>
    %c0_17 = arith.constant 0 : index
    %c0_18 = arith.constant 0 : index
    %18 = vector.load %arg8[%c0_17, %c0_18] : memref<1x32xf32, #tpu.memory_space<vmem>>, vector<1x32xf32>
    %19 = vector.broadcast %18 : vector<1x32xf32> to vector<16x32xf32>
    %20 = arith.addf %17, %19 : vector<16x32xf32>
    %21 = arith.truncf %20 : vector<16x32xf32> to vector<16x32xbf16>
    %c0_19 = arith.constant 0 : index
    %c0_20 = arith.constant 0 : index
    %22 = vector.load %arg11[%c0_19, %c0_20] : memref<16x32xbf16, #tpu.memory_space<vmem>>, vector<16x32xbf16>
    tpu.vector_store %arg11[%c0_19, %c0_20], %21 {strides = array<i32>} : memref<16x32xbf16, #tpu.memory_space<vmem>>, vector<16x32xbf16>,
    return
  }
  func.func @transform_0(%arg0: i32, %arg1: i32) -> (i32, i32) {
    %c0_i32 = arith.constant 0 : i32
    %c0_i32_0 = arith.constant 0 : i32
    return %arg0, %c0_i32 : i32, i32
  }
  func.func @transform_1(%arg0: i32, %arg1: i32) -> (i32, i32) {
    %c0_i32 = arith.constant 0 : i32
    %c0_i32_0 = arith.constant 0 : i32
    return %c0_i32, %arg1 : i32, i32
  }
  func.func @transform_2(%arg0: i32, %arg1: i32) -> (i32, i32) {
    %c0_i32 = arith.constant 0 : i32
    %c0_i32_0 = arith.constant 0 : i32
    return %c0_i32, %arg1 : i32, i32
  }
  func.func @transform_3(%arg0: i32, %arg1: i32) -> (i32, i32) {
    %c0_i32 = arith.constant 0 : i32
    %c0_i32_0 = arith.constant 0 : i32
    return %c0_i32, %arg1 : i32, i32
  }
  func.func @transform_4(%arg0: i32, %arg1: i32) -> (i32, i32) {
    %c0_i32 = arith.constant 0 : i32
    %c0_i32_0 = arith.constant 0 : i32
    return %c0_i32, %arg1 : i32, i32
  }
  func.func @transform_5(%arg0: i32, %arg1: i32) -> (i32, i32) {
    %c0_i32 = arith.constant 0 : i32
    %c0_i32_0 = arith.constant 0 : i32
    return %c0_i32, %arg1 : i32, i32
  }
  func.func @transform_6(%arg0: i32, %arg1: i32) -> (i32, i32) {
    %c0_i32 = arith.constant 0 : i32
    %c0_i32_0 = arith.constant 0 : i32
    return %c0_i32, %arg1 : i32, i32
  }
  func.func @transform_7(%arg0: i32, %arg1: i32) -> (i32, i32) {
    %c0_i32 = arith.constant 0 : i32
    return %arg0, %arg1 : i32, i32
  }
  func.func @transform_8(%arg0: i32, %arg1: i32) -> (i32, i32) {
    %c0_i32 = arith.constant 0 : i32
    return %arg0, %arg1 : i32, i32
  }
  func.func @transform_9(%arg0: i32, %arg1: i32) -> (i32, i32) {
    %c0_i32 = arith.constant 0 : i32
    return %arg0, %arg1 : i32, i32
  }
}

</mosaic_0001>

<bundles_post_ra>
// kernel: tpu_custom_call.1
= control target key start
LH: loop header
LB: loop body
LE: loop exit
PB: predicated region body
PF: predicated region fallthrough
CT: control target
= control target key end

     0   :  { %15 = vsyncpa [#allocation3], 0  ;;  %s804_s0 = inlined_call_operand.hbm [shape: f32[16,32], index: 0, kind: input, shape index: {}]   ;;  %s805_s1 = inlined_call_operand.hbm [shape: bf16[32,32], index: 1, kind: input, shape index: {}]   ;;  %s806_s2 = inlined_call_operand.hbm [shape: bf16[32,32], index: 2, kind: input, shape index: {}]   ;;  %s807_s3 = inlined_call_operand.hbm [shape: bf16[32,32], index: 3, kind: input, shape index: {}]   ;;  %s808_s4 = inlined_call_operand.vmem [shape: f32[1,32], index: 4, kind: input, shape index: {}]   ;;  %s809_s5 = inlined_call_operand.vmem [shape: f32[1,32], index: 5, kind: input, shape index: {}]   ;;  %s810_s6 = inlined_call_operand.vmem [shape: f32[1,32], index: 6, kind: input, shape index: {}]   ;;  %s811_s7 = inlined_call_operand.hbm [shape: bf16[16,32], index: 7, kind: output, shape index: {0}]   ;;  %s812_s8 = inlined_call_operand.hbm [shape: bf16[16,32], index: 8, kind: output, shape index: {1}]   ;;  %s813_s9 = inlined_call_operand.hbm [shape: bf16[16,32], index: 9, kind: output, shape index: {2}]  }
   0x1   :  { %16 = vsyncpa [#allocation6], 0 }
   0x2   :  { %17 = vsyncpa [#allocation9], 0 }
   0x3   :  { %18 = vsyncpa [#allocation4], 0 }
   0x4   :  { %19 = vsyncpa [#allocation12], 0  ;;  %s607_s30 = smov [#allocation5]   ;;  %s443_s13 = scalar_lea.hbm %s805_s1, 256 }
   0x5   :  { %s37_s10 = sshll.u32 %s607_s30, 4  ;;  %p444_p0 = scmp.ne.s32.totalorder %s805_s1, %s443_s13  ;;  %s38_s10 = int_to_ptr.vmem [resolvable:$true] %s37_s10 }
   0x6   :  { %p447_p1 = scmp.lt.u32.totalorder %s443_s13, %s805_s1 }
   0x8   :  { %p449_p2 = pnand %p447_p1, %p444_p0 }
   0xa   :  { %452 = shalt.err (!%p449_p2)
}
   0xb   :  { %s453_s18 = scalar_lea.vmem %s38_s10, 256  ;;  %p458_p4 = scmp.lt.s32.totalorder %s38_s10, %s38_s10 }
   0xc   :  { %p454_p3 = scmp.ne.s32.totalorder %s38_s10, %s453_s18  ;;  %p459_p5 = scmp.lt.s32.totalorder %s453_s18, %s453_s18 }
   0xe   :  { %p460_p6 = por %p459_p5, %p458_p4 }
  0x10   :  { %p461_p7 = pnand %p460_p6, %p454_p3 }
  0x12   :  { %464 = shalt.err (!%p461_p7)
}
  0x13   :  { %s608_s19 = smov 64   ;;  %s609_s20 = smov 4  }
  0x14   :  { %43 = dma.hbm_to_vmem [thread:$0]  %s805_s1, 256, %s38_s10, [#allocation6], %s608_s19, %s608_s19, %s609_s20  }
  0x15   :  { %s610_s23 = smov [#allocation2]   ;;  %s465_s27 = scalar_lea.hbm %s804_s0, 256 }
  0x16   :  { %s25_s24 = sshll.u32 %s610_s23, 4  ;;  %p466_p8 = scmp.ne.s32.totalorder %s804_s0, %s465_s27  ;;  %s26_s24 = int_to_ptr.vmem [resolvable:$true] %s25_s24 }
  0x17   :  { %p469_p9 = scmp.lt.u32.totalorder %s465_s27, %s804_s0 }
  0x19   :  { %p471_p10 = pnand %p469_p9, %p466_p8 }
  0x1b   :  { %474 = shalt.err (!%p471_p10)
}
  0x1c   :  { %s475_s12 = scalar_lea.vmem %s26_s24, 256  ;;  %p480_p12 = scmp.lt.s32.totalorder %s26_s24, %s26_s24 }
  0x1d   :  { %p476_p11 = scmp.ne.s32.totalorder %s26_s24, %s475_s12  ;;  %p481_p13 = scmp.lt.s32.totalorder %s475_s12, %s475_s12 }
  0x1f   :  { %p482_p0 = por %p481_p13, %p480_p12 }
  0x21   :  { %p483_p1 = pnand %p482_p0, %p476_p11 }
  0x23   :  { %486 = shalt.err (!%p483_p1)
}
  0x24   :  { %s611_s1 = smov 128   ;;  %s612_s10 = smov 8  }
  0x25   :  { %31 = dma.hbm_to_vmem [thread:$0]  %s804_s0, 256, %s26_s24, [#allocation3], %s611_s1, %s611_s1, %s612_s10  }
  0x26   :  { %s613_s15 = smov [#allocation7]   ;;  %s614_s17 = smov [#allocation8]  }
  0x27   :  { %s49_s16 = sshll.u32 %s613_s15, 4  ;;  %s61_s18 = sshll.u32 %s614_s17, 4  ;;  %s50_s16 = int_to_ptr.vmem [resolvable:$true] %s49_s16  ;;  %s697_s18 = int_to_ptr.vmem [resolvable:$true] %s61_s18 }
  0x28   :  { %s487_s23 = scalar_lea.hbm %s806_s2, 256 }
  0x29   :  { %p488_p2 = scmp.ne.s32.totalorder %s806_s2, %s487_s23  ;;  %p491_p3 = scmp.lt.u32.totalorder %s487_s23, %s806_s2 }
  0x2b   :  { %p493_p4 = pnand %p491_p3, %p488_p2 }
  0x2d   :  { %496 = shalt.err (!%p493_p4)
}
  0x2e   :  { %s497_s0 = scalar_lea.vmem %s50_s16, 256  ;;  %p502_p6 = scmp.lt.s32.totalorder %s50_s16, %s50_s16 }
  0x2f   :  { %p498_p5 = scmp.ne.s32.totalorder %s50_s16, %s497_s0  ;;  %p503_p7 = scmp.lt.s32.totalorder %s497_s0, %s497_s0 }
  0x31   :  { %p504_p8 = por %p503_p7, %p502_p6 }
  0x33   :  { %p505_p9 = pnand %p504_p8, %p498_p5 }
  0x35   :  { %508 = shalt.err (!%p505_p9)
}
  0x36   :  { %55 = dma.hbm_to_vmem [thread:$0]  %s806_s2, 256, %s50_s16, [#allocation6], %s608_s19, %s608_s19, %s609_s20  }
  0x37   :  { %s509_s12 = scalar_lea.hbm %s807_s3, 256 }
  0x38   :  { %p510_p10 = scmp.ne.s32.totalorder %s807_s3, %s509_s12  ;;  %p513_p11 = scmp.lt.u32.totalorder %s509_s12, %s807_s3 }
  0x3a   :  { %p515_p12 = pnand %p513_p11, %p510_p10 }
  0x3c   :  { %518 = shalt.err (!%p515_p12)
}
  0x3d   :  { %s519_s15 = scalar_lea.vmem %s697_s18, 256  ;;  %p524_p0 = scmp.lt.s32.totalorder %s697_s18, %s697_s18 }
  0x3e   :  { %p520_p13 = scmp.ne.s32.totalorder %s697_s18, %s519_s15  ;;  %p525_p1 = scmp.lt.s32.totalorder %s519_s15, %s519_s15 }
  0x40   :  { %p526_p2 = por %p525_p1, %p524_p0 }
  0x42   :  { %p527_p3 = pnand %p526_p2, %p520_p13 }
  0x44   :  { %530 = shalt.err (!%p527_p3)
}
  0x45   :  { %67 = dma.hbm_to_vmem [thread:$0]  %s807_s3, 256, %s697_s18, [#allocation9], %s608_s19, %s608_s19, %s609_s20  }
  0x46   :  { %597 = dma.done.wait [#allocation3], 256  }
  0x47   :  { %598 = vsyncadd [#allocation3], 4294967040 }
  0x48   :  { %599 = dma.done.wait [#allocation6], 512  }
  0x49   :  { %600 = vsyncadd [#allocation6], 4294966784 }
  0x4a   :  { %601 = dma.done.wait [#allocation9], 256  }
  0x4b   :  { %602 = vsyncadd [#allocation9], 4294967040  ;;  %v615_v0 = vmov 0.0   ;;  %vm616_vm0 = vmmov 0   ;;  %v437_v1 = vld [vmem:[#allocation5] sm:$0xff]   ;;  %v438_v2 = vld [vmem:[#allocation5 + $0x8] sm:$0xff]  }
  0x4c   :  { %400 = vmatprep.subr.bf16.mxu0 %v615_v0  ;;  %408 = vmatprep.subr.bf16.mxu1 %v615_v0  ;;  %v439_v3 = vld [vmem:[#allocation7] sm:$0xff]   ;;  %v88_v5 = vld [vmem:[#allocation2 + $0x8] sm:$0xff]  ;;  %vm113_vm1 = vcmask 261120   ;;  %v440_v8 = vld [vmem:[#allocation8] sm:$0xff]   ;;  %vm166_vm2 = vcmask 257024   ;;  %s617_s22 = smov [#allocation10]  }
  0x4d   :  { %404 = vmatprep.mubr.msk.bf16.mxu0 %vm616_vm0, %v615_v0  ;;  %412 = vmatprep.mubr.msk.bf16.mxu1 %vm616_vm0, %v615_v0  ;;  %v87_v4 = vld [vmem:[#allocation2] sm:$0xff]  ;;  %v441_v7 = vld [vmem:[#allocation7 + $0x8] sm:$0xff]   ;;  %v442_v9 = vld [vmem:[#allocation8 + $0x8] sm:$0xff]   ;;  %s322_s23 = sshll.u32 %s617_s22, 4  ;;  %s618_s25 = smov [#allocation11]   ;;  %s323_s23 = int_to_ptr.vmem [resolvable:$true] %s322_s23 }
  0x4e   :  { %401 = vmatpush3.bf16.msra.mxu0 %v437_v1  ;;  %409 = vmatpush3.bf16.msra.mxu1 %v439_v3  ;;  %v89_v6 = vpack.c.bf16 %v88_v5, %v87_v4  ;;  %v367_v10 = vld [vmem:[%s808_s4] ss:$0 sm:$0xff]  ;;  %s334_s4 = sshll.u32 %s618_s25, 4  ;;  %s531_s27 = scalar_lea.vmem %s323_s23, 128  ;;  %s749_s4 = int_to_ptr.vmem [resolvable:$true] %s334_s4 }
  0x4f   :  { %402 = vmatprep.subr.bf16.mxu0 %v615_v0  ;;  %410 = vmatprep.subr.bf16.mxu1 %v615_v0  ;;  %v373_v12 = vld [vmem:[%s809_s5] ss:$0 sm:$0xff]  ;;  %p532_p4 = scmp.ne.s32.totalorder %s323_s23, %s531_s27  ;;  %p536_p5 = scmp.lt.s32.totalorder %s323_s23, %s323_s23 }
  0x50   :  { %v379_v27 = vld [vmem:[%s810_s6] ss:$0 sm:$0xff]  ;;  %p537_p6 = scmp.lt.s32.totalorder %s531_s27, %s531_s27 }
  0x52   :  { %403 = vmatpush3.bf16.msra.mxu0 %v438_v2  ;;  %411 = vmatpush3.bf16.msra.mxu1 %v441_v7  ;;  %p538_p7 = por %p537_p6, %p536_p5 }
  0x53   :  { %416 = vmatprep.subr.bf16.mxu0 %v615_v0 }
  0x54   :  { %p539_p8 = pnand %p538_p7, %p532_p4 }
  0x55   :  { %405 = vmatmul.mubr.msk.bf16.vlgmr.msra.gmra.mrb[0].mxu0 %vm113_vm1, %v89_v6  ;;  %413 = vmatmul.mubr.msk.bf16.vlgmr.msra.gmra.mrb[0].mxu1 %vm113_vm1, %v89_v6 }
  0x56   :  { %417 = vmatpush3.bf16.msra.mxu0 %v440_v8  ;;  %420 = vmatprep.mubr.msk.bf16.mxu0 %vm616_vm0, %v615_v0 }
  0x57   :  { %418 = vmatprep.subr.bf16.mxu0 %v615_v0 }
  0x5a   :  { %419 = vmatpush3.bf16.msra.mxu0 %v442_v9 }
  0x5d   :  { %421 = vmatmul.mubr.msk.bf16.vlgmr.msra.gmra.mrb[4].mxu0 %vm113_vm1, %v89_v6 }
 0x128   :  { %v151_v11 = vpop.f32.mrb[0].mxu0  ;;  %v226_v16 = vpop.f32.mrb[0].mxu1 }
 0x129   :  { %v152_v13 = vadd.f32 %v367_v10, %v151_v11  ;;  %v406_v14 = vpop.f32.mrb[1].mxu0  ;;  %v227_v20 = vadd.f32 %v373_v12, %v226_v16  ;;  %v414_v21 = vpop.f32.mrb[1].mxu1 }
 0x12a   :  { %v154_v15 = vpop.f32.mrb[2].mxu0  ;;  %v229_v22 = vpop.f32.mrb[2].mxu1 }
 0x12b   :  { %v385_v17 = vpack.c.bf16 %v152_v13, %v152_v13  ;;  %v155_v18 = vadd.f32 %v367_v10, %v154_v15  ;;  %v407_v19 = vpop.f32.mrb[3].mxu0  ;;  %v387_v24 = vpack.c.bf16 %v227_v20, %v227_v20  ;;  %v230_v25 = vadd.f32 %v373_v12, %v229_v22  ;;  %v415_v26 = vpop.f32.mrb[3].mxu1 }
 0x12d   :  { %v386_v23 = vpack.c.bf16 %v155_v18, %v155_v18  ;;  %167 = vst.msk [vmem:[#allocation10] sm:$0xf] %vm166_vm2, %v385_v17  ;;  %v388_v28 = vpack.c.bf16 %v230_v25, %v230_v25  ;;  %241 = vst.msk [vmem:[#allocation11] sm:$0xf] %vm166_vm2, %v387_v24 }
 0x12f   :  { %168 = vst.msk [vmem:[#allocation10 + $0x4] sm:$0xf] %vm166_vm2, %v386_v23 }
 0x130   :  { %v300_v29 = vpop.f32.mrb[4].mxu0 }
 0x131   :  { %542 = shalt.err (!%p539_p8)
}
 0x132   :  { %s543_s24 = scalar_lea.hbm %s811_s7, 128 }
 0x133   :  { %p544_p9 = scmp.ne.s32.totalorder %s811_s7, %s543_s24  ;;  %p547_p10 = scmp.lt.u32.totalorder %s543_s24, %s811_s7 }
 0x135   :  { %p549_p11 = pnand %p547_p10, %p544_p9 }
 0x137   :  { %552 = shalt.err (!%p549_p11)
}
 0x138   :  { %328 = dma.vmem_to_hbm [thread:$0]  %s323_s23, 128, %s811_s7, [#allocation4], %s608_s19, %s608_s19, %s609_s20   ;;  %v301_v30 = vadd.f32 %v379_v27, %v300_v29  ;;  %242 = vst.msk [vmem:[#allocation11 + $0x4] sm:$0xf] %vm166_vm2, %v388_v28  ;;  %v422_v31 = vpop.f32.mrb[5].mxu0 }
 0x139   :  { %s619_s10 = smov [#allocation13]   ;;  %v303_v32 = vpop.f32.mrb[6].mxu0  ;;  %s553_s14 = scalar_lea.vmem %s749_s4, 128 }
 0x13a   :  { %s346_s13 = sshll.u32 %s619_s10, 4  ;;  %p554_p12 = scmp.ne.s32.totalorder %s749_s4, %s553_s14  ;;  %s347_s13 = int_to_ptr.vmem [resolvable:$true] %s346_s13 }
 0x13b   :  { %p558_p13 = scmp.lt.s32.totalorder %s749_s4, %s749_s4  ;;  %p559_p0 = scmp.lt.s32.totalorder %s553_s14, %s553_s14 }
 0x13d   :  { %p560_p1 = por %p559_p0, %p558_p13 }
 0x13f   :  { %p561_p2 = pnand %p560_p1, %p554_p12 }
 0x141   :  { %564 = shalt.err (!%p561_p2)
}
 0x142   :  { %s565_s16 = scalar_lea.hbm %s812_s8, 128 }
 0x143   :  { %p566_p3 = scmp.ne.s32.totalorder %s812_s8, %s565_s16  ;;  %p569_p4 = scmp.lt.u32.totalorder %s565_s16, %s812_s8 }
 0x145   :  { %p571_p5 = pnand %p569_p4, %p566_p3 }
 0x147   :  { %574 = shalt.err (!%p571_p5)
}
 0x148   :  { %340 = dma.vmem_to_hbm [thread:$0]  %s749_s4, 128, %s812_s8, [#allocation12], %s608_s19, %s608_s19, %s609_s20   ;;  %v389_v33 = vpack.c.bf16 %v301_v30, %v301_v30  ;;  %v304_v34 = vadd.f32 %v379_v27, %v303_v32  ;;  %v423_v35 = vpop.f32.mrb[7].mxu0 }
 0x149   :  { %s575_s23 = scalar_lea.vmem %s347_s13, 128  ;;  %p580_p7 = scmp.lt.s32.totalorder %s347_s13, %s347_s13 }
 0x14a   :  { %315 = vst.msk [vmem:[#allocation13] sm:$0xf] %vm166_vm2, %v389_v33  ;;  %v390_v36 = vpack.c.bf16 %v304_v34, %v304_v34  ;;  %p576_p6 = scmp.ne.s32.totalorder %s347_s13, %s575_s23  ;;  %p581_p8 = scmp.lt.s32.totalorder %s575_s23, %s575_s23 }
 0x14c   :  { %316 = vst.msk [vmem:[#allocation13 + $0x4] sm:$0xf] %vm166_vm2, %v390_v36  ;;  %p582_p9 = por %p581_p8, %p580_p7 }
 0x14e   :  { %p583_p10 = pnand %p582_p9, %p576_p6 }
 0x150   :  { %586 = shalt.err (!%p583_p10)
}
 0x151   :  { %s587_s8 = scalar_lea.hbm %s813_s9, 128 }
 0x152   :  { %p588_p11 = scmp.ne.s32.totalorder %s813_s9, %s587_s8  ;;  %p591_p12 = scmp.lt.u32.totalorder %s587_s8, %s813_s9 }
 0x154   :  { %p593_p13 = pnand %p591_p12, %p588_p11 }
 0x156   :  { %596 = shalt.err (!%p593_p13)
}
 0x157   :  { %352 = dma.vmem_to_hbm [thread:$0]  %s347_s13, 128, %s813_s9, [#allocation12], %s608_s19, %s608_s19, %s609_s20  }
 0x158   :  { %603 = dma.done.wait [#allocation4], 128  }
 0x159   :  { %604 = vsyncadd [#allocation4], 4294967168 }
 0x15a   :  { %605 = dma.done.wait [#allocation12], 256  }
 0x15b   :  { %606 = vsyncadd [#allocation12], 4294967040 }
 0x15c   :  { %362 = vsyncpa [#allocation3], 1 }
 0x15d   :  { %363 = vsyncpa [#allocation6], 1 }
 0x15e   :  { %364 = vsyncpa [#allocation9], 1 }
 0x15f   :  { %365 = vsyncpa [#allocation4], 1 }
 0x160   :  { %366 = vsyncpa [#allocation12], 1 }

</bundles_post_ra>
